<compile_context>
chip_gen: v6e
topology: v6e:2x2x1
jax: 0.10.0
libtpu: 0.0.40
codegen_flags: <defaults>
</compile_context>

<pallas_src>
import jax
import jax.numpy as jnp
from jax.experimental import pallas as pl
from jax.experimental.pallas import tpu as pltpu


# ----------------------------- kernel -----------------------------

def fcae_kernel(x_ref,
                w1_ref, b1_ref, w2_ref, b2_ref,   # encoder ([in,out] bf16, [1,out] f32)
                w3_ref, b3_ref, w4_ref, b4_ref,   # decoder
                z_ref, xhat_ref):
    cdt = w1_ref.dtype                     # bf16 MXU operand dtype
    x = x_ref[...].astype(cdt)             # in-register cast (x streamed as stored)

    # ---- encoder ----
    h1 = jnp.dot(x, w1_ref[...], preferred_element_type=jnp.float32) + b1_ref[...]
    h1 = jnp.maximum(h1, 0.0)              # f32 activations
    z = jnp.dot(h1.astype(cdt), w2_ref[...],
                preferred_element_type=jnp.float32) + b2_ref[...]

    # ---- decoder ----
    h2 = jnp.dot(z.astype(cdt), w3_ref[...],
                 preferred_element_type=jnp.float32) + b3_ref[...]
    h2 = jnp.maximum(h2, 0.0)
    xhat = jnp.dot(h2.astype(cdt), w4_ref[...],
                   preferred_element_type=jnp.float32) + b4_ref[...]

    z_ref[...] = z.astype(z_ref.dtype)
    xhat_ref[...] = xhat.astype(xhat_ref.dtype)


# ----------------------------- params -----------------------------

def xavier_normal(key, fan_out, fan_in, dtype=jnp.float32):
    # PyTorch nn.init.xavier_normal_: std = sqrt(2/(fan_in+fan_out)), weight [out, in].
    std = (2.0 / (fan_in + fan_out)) ** 0.5
    return std * jax.random.normal(key, (fan_out, fan_in), dtype=dtype)


def make_fcae_params(key, in_dim, hidden_dim, latent_dim):
    k1, k2, k3, k4 = jax.random.split(key, 4)
    return {
        # encoder
        "w1": xavier_normal(k1, hidden_dim, in_dim),
        "b1": jnp.zeros((hidden_dim,), jnp.float32),
        "w2": xavier_normal(k2, latent_dim, hidden_dim),
        "b2": jnp.zeros((latent_dim,), jnp.float32),
        # decoder
        "w3": xavier_normal(k3, hidden_dim, latent_dim),
        "b3": jnp.zeros((hidden_dim,), jnp.float32),
        "w4": xavier_normal(k4, in_dim, hidden_dim),
        "b4": jnp.zeros((in_dim,), jnp.float32),
    }


# ----------------------------- wrapper -----------------------------

def _round_up(n, m):
    return ((n + m - 1) // m) * m


def _pad2(a, rows, cols):
    pr, pc = rows - a.shape[0], cols - a.shape[1]
    if pr == 0 and pc == 0:
        return a                                   # no-op: don't emit a pad pass
    return jnp.pad(a, ((0, pr), (0, pc)))


def _vmem_budget_bytes():
    cap = 64 * 1024 * 1024                         # conservative default (v7x per-TC)
    try:
        info = pltpu.get_tpu_info()
        cap = int(getattr(info, "vmem_capacity_bytes", cap))
    except Exception:
        pass
    return max(16 * 1024 * 1024, int(0.65 * cap))  # headroom for compiler scratch


_SUB = 16   # batch-tile granularity: covers bf16 sublane packing (16) and f32 (8)


def fcae_forward(x, params, *, batch_tile=None, target_tile=2048,
                 out_dtype=jnp.bfloat16):
    """Fused FCAE forward on TPU.

    x: [B, D] float32 or bfloat16.  Returns (z [B, L], x_hat [B, D]) in
    `out_dtype` (bf16 default to halve output HBM traffic; pass jnp.float32
    to match the PyTorch module exactly).
    """
    B, D = x.shape
    H = params["w1"].shape[0]
    L = params["w2"].shape[0]

    # ---- lane-dense feature padding (multiples of 128) ----
    Dp = _round_up(D, 128)
    Hp = _round_up(H, 128)
    Lp = _round_up(L, 128)

    # ---- batch tiling: tile-to-fit, even #steps (>=2) for v7x megacore ----
    if batch_tile is None:
        n_guess = max(1, pl.cdiv(B, target_tile))
        if B > _SUB:                      # enough rows for >=2 pipelined steps
            n_guess = max(n_guess, 2)
            if n_guess % 2:               # even step count -> balanced 2-TC split
                n_guess += 1
        batch_tile = _round_up(pl.cdiv(B, n_guess), _SUB)
    batch_tile = max(_SUB, _round_up(batch_tile, _SUB))
    Bp = _round_up(B, batch_tile)
    n_steps = Bp // batch_tile

    # ---- glue: pad only as needed; NO dtype cast on x (kernel casts in-reg) ----
    x_p = _pad2(x, Bp, Dp)
    w1 = _pad2(params["w1"].T, Dp, Hp).astype(jnp.bfloat16)
    w2 = _pad2(params["w2"].T, Hp, Lp).astype(jnp.bfloat16)
    w3 = _pad2(params["w3"].T, Lp, Hp).astype(jnp.bfloat16)
    w4 = _pad2(params["w4"].T, Hp, Dp).astype(jnp.bfloat16)
    b1 = _pad2(params["b1"][None, :].astype(jnp.float32), 1, Hp)
    b2 = _pad2(params["b2"][None, :].astype(jnp.float32), 1, Lp)
    b3 = _pad2(params["b3"][None, :].astype(jnp.float32), 1, Hp)
    b4 = _pad2(params["b4"][None, :].astype(jnp.float32), 1, Dp)

    x_item = jnp.dtype(x.dtype).itemsize
    out_item = jnp.dtype(out_dtype).itemsize

    def run(weight_mode, wbuf):
        # VMEM estimate: streamed I/O double-buffered, weights use `wbuf`
        # buffers, f32 intermediates (h1/z/h2/xhat) in compiler-managed scratch.
        io_bytes = 2 * batch_tile * (Dp * x_item + (Lp + Dp) * out_item)
        w_bytes = wbuf * (2 * (Dp * Hp + Hp * Lp + Lp * Hp + Hp * Dp)
                          + 4 * (2 * Hp + Lp + Dp))
        inter_bytes = 4 * batch_tile * (2 * Hp + Lp + Dp)
        vmem_limit = int(min(_vmem_budget_bytes(),
                             max(16 * 1024 * 1024,
                                 2 * (io_bytes + inter_bytes) + w_bytes)))

        def rep(shape):
            # Resident params: constant index map -> DMA'd once, never refreshed.
            if weight_mode is None:
                return pl.BlockSpec(shape, lambda i: (0, 0))
            return pl.BlockSpec(shape, lambda i: (0, 0), pipeline_mode=weight_mode)

        return pl.pallas_call(
            fcae_kernel,
            out_shape=(
                jax.ShapeDtypeStruct((Bp, Lp), out_dtype),   # z (padded)
                jax.ShapeDtypeStruct((Bp, Dp), out_dtype),   # x_hat (padded)
            ),
            grid_spec=pltpu.PrefetchScalarGridSpec(
                num_scalar_prefetch=0,
                grid=(n_steps,),
                in_specs=[
                    pl.BlockSpec((batch_tile, Dp), lambda i: (i, 0)),   # x
                    rep((Dp, Hp)), rep((1, Hp)),                        # w1, b1
                    rep((Hp, Lp)), rep((1, Lp)),                        # w2, b2
                    rep((Lp, Hp)), rep((1, Hp)),                        # w3, b3
                    rep((Hp, Dp)), rep((1, Dp)),                        # w4, b4
                ],
                out_specs=[
                    pl.BlockSpec((batch_tile, Lp), lambda i: (i, 0)),   # z
                    pl.BlockSpec((batch_tile, Dp), lambda i: (i, 0)),   # x_hat
                ],
            ),
            compiler_params=pltpu.CompilerParams(
                dimension_semantics=("parallel",),
                vmem_limit_bytes=vmem_limit),
        )(x_p, w1, b1, w2, b2, w3, b3, w4, b4)

    try:
        # Single-buffer the never-changing weights (halves their VMEM footprint).
        z_p, xhat_p = run(pl.Buffered(1), 1)
    except Exception:
        z_p, xhat_p = run(None, 2)   # fallback: default double-buffering

    # Slice only when padding was actually applied.
    z_out = z_p if (Bp == B and Lp == L) else z_p[:B, :L]
    xhat_out = xhat_p if (Bp == B and Dp == D) else xhat_p[:B, :D]
    return z_out, xhat_out


# ----------------------------- reference -----------------------------

def fcae_ref(x, params):
    """Pure-JAX f32 reference mirroring the PyTorch forward."""
    x = x.astype(jnp.float32)
    h1 = jnp.maximum(x @ params["w1"].T + params["b1"], 0.0)
    z = h1 @ params["w2"].T + params["b2"]
    h2 = jnp.maximum(z @ params["w3"].T + params["b3"], 0.0)
    x_hat = h2 @ params["w4"].T + params["b4"]
    return z, x_hat


if __name__ == "__main__":
    key = jax.random.PRNGKey(0)
    k_x, k_p, k_x2 = jax.random.split(key, 3)

    B, D, H, L = 8, 64, 32, 16          # small shapes consistent with an MLP AE
    x = jax.random.normal(k_x, (B, D), dtype=jnp.float32)
    params = make_fcae_params(k_p, in_dim=D, hidden_dim=H, latent_dim=L)

    # bf16-in/bf16-out matmuls vs f32 reference -> loosened tolerances
    ATOL = RTOL = 7e-2

    # single-tile path (f32 input, bf16 outputs)
    z, x_hat = fcae_forward(x, params)
    jax.block_until_ready((z, x_hat))
    z_ref, x_hat_ref = fcae_ref(x, params)
    assert z.shape == (B, L) and x_hat.shape == (B, D)
    assert jnp.allclose(z.astype(jnp.float32), z_ref, atol=ATOL, rtol=RTOL)
    assert jnp.allclose(x_hat.astype(jnp.float32), x_hat_ref, atol=ATOL, rtol=RTOL)

    # multi-tile path (grid of 2 parallel steps, exercises batch tiling)
    B2 = 64
    x2 = jax.random.normal(k_x2, (B2, D), dtype=jnp.float32)
    z2, x_hat2 = fcae_forward(x2, params)
    jax.block_until_ready((z2, x_hat2))
    z2_ref, x_hat2_ref = fcae_ref(x2, params)
    assert z2.shape == (B2, L) and x_hat2.shape == (B2, D)
    assert jnp.allclose(z2.astype(jnp.float32), z2_ref, atol=ATOL, rtol=RTOL)
    assert jnp.allclose(x_hat2.astype(jnp.float32), x_hat2_ref, atol=ATOL, rtol=RTOL)

    # bf16-input path (caller-supplied bf16 x: no wrapper cast at all)
    x2b = x2.astype(jnp.bfloat16)
    z3, x_hat3 = fcae_forward(x2b, params)
    jax.block_until_ready((z3, x_hat3))
    z3_ref, x_hat3_ref = fcae_ref(x2b, params)   # ref on the rounded input
    assert jnp.allclose(z3.astype(jnp.float32), z3_ref, atol=ATOL, rtol=RTOL)
    assert jnp.allclose(x_hat3.astype(jnp.float32), x_hat3_ref, atol=ATOL, rtol=RTOL)

    print("KERNEL_OK")
</pallas_src>

<mosaic_0001>
module attributes {stable_mosaic.version = 11 : i64} {
  func.func @fcae_kernel(%arg0: i32, %arg1: memref<16x128xf32, #tpu.memory_space<vmem>>, %arg2: memref<128x128xbf16, #tpu.memory_space<vmem>>, %arg3: memref<1x128xf32, #tpu.memory_space<vmem>>, %arg4: memref<128x128xbf16, #tpu.memory_space<vmem>>, %arg5: memref<1x128xf32, #tpu.memory_space<vmem>>, %arg6: memref<128x128xbf16, #tpu.memory_space<vmem>>, %arg7: memref<1x128xf32, #tpu.memory_space<vmem>>, %arg8: memref<128x128xbf16, #tpu.memory_space<vmem>>, %arg9: memref<1x128xf32, #tpu.memory_space<vmem>>, %arg10: memref<16x128xbf16, #tpu.memory_space<vmem>>, %arg11: memref<16x128xbf16, #tpu.memory_space<vmem>>) attributes {dimension_semantics = [#tpu.dimension_semantics<parallel>], iteration_bounds = array<i64: 1>, scalar_prefetch = 0 : i64, scratch_operands = 0 : i64, tpu.core_type = #tpu.core_type<tc>, window_params = [{transform_indices = @transform_0, window_bounds = array<i64: 16, 128>}, {pipeline_mode = #tpu.pipeline_mode<synchronous>, transform_indices = @transform_1, window_bounds = array<i64: 128, 128>}, {pipeline_mode = #tpu.pipeline_mode<synchronous>, transform_indices = @transform_2, window_bounds = array<i64: 1, 128>}, {pipeline_mode = #tpu.pipeline_mode<synchronous>, transform_indices = @transform_3, window_bounds = array<i64: 128, 128>}, {pipeline_mode = #tpu.pipeline_mode<synchronous>, transform_indices = @transform_4, window_bounds = array<i64: 1, 128>}, {pipeline_mode = #tpu.pipeline_mode<synchronous>, transform_indices = @transform_5, window_bounds = array<i64: 128, 128>}, {pipeline_mode = #tpu.pipeline_mode<synchronous>, transform_indices = @transform_6, window_bounds = array<i64: 1, 128>}, {pipeline_mode = #tpu.pipeline_mode<synchronous>, transform_indices = @transform_7, window_bounds = array<i64: 128, 128>}, {pipeline_mode = #tpu.pipeline_mode<synchronous>, transform_indices = @transform_8, window_bounds = array<i64: 1, 128>}, {transform_indices = @transform_9, window_bounds = array<i64: 16, 128>}, {transform_indices = @transform_10, window_bounds = array<i64: 16, 128>}]} {
    %c0 = arith.constant 0 : index
    %c0_0 = arith.constant 0 : index
    %0 = vector.load %arg1[%c0, %c0_0] : memref<16x128xf32, #tpu.memory_space<vmem>>, vector<16x128xf32>
    %1 = arith.truncf %0 : vector<16x128xf32> to vector<16x128xbf16>
    %c0_1 = arith.constant 0 : index
    %c0_2 = arith.constant 0 : index
    %2 = vector.load %arg2[%c0_1, %c0_2] : memref<128x128xbf16, #tpu.memory_space<vmem>>, vector<128x128xbf16>
    %cst = arith.constant dense<0.000000e+00> : vector<16x128xf32>
    %3 = tpu.matmul %1, %2, %cst {dimension_numbers = #tpu.dot_dimension_numbers<[1], [0], [0], [1], [0, 0, 1, 1], [], []>} : vector<16x128xbf16>, vector<128x128xbf16>, vector<16x128xf32> -> vector<16x128xf32>
    %c0_3 = arith.constant 0 : index
    %c0_4 = arith.constant 0 : index
    %4 = vector.load %arg3[%c0_3, %c0_4] : memref<1x128xf32, #tpu.memory_space<vmem>>, vector<1x128xf32>
    %5 = vector.broadcast %4 : vector<1x128xf32> to vector<16x128xf32>
    %6 = arith.addf %3, %5 : vector<16x128xf32>
    %cst_5 = arith.constant 0.000000e+00 : f32
    %7 = vector.broadcast %cst_5 : f32 to vector<16x128xf32>
    %8 = arith.maximumf %6, %7 : vector<16x128xf32>
    %9 = arith.truncf %8 : vector<16x128xf32> to vector<16x128xbf16>
    %c0_6 = arith.constant 0 : index
    %c0_7 = arith.constant 0 : index
    %10 = vector.load %arg4[%c0_6, %c0_7] : memref<128x128xbf16, #tpu.memory_space<vmem>>, vector<128x128xbf16>
    %cst_8 = arith.constant dense<0.000000e+00> : vector<16x128xf32>
    %11 = tpu.matmul %9, %10, %cst_8 {dimension_numbers = #tpu.dot_dimension_numbers<[1], [0], [0], [1], [0, 0, 1, 1], [], []>} : vector<16x128xbf16>, vector<128x128xbf16>, vector<16x128xf32> -> vector<16x128xf32>
    %c0_9 = arith.constant 0 : index
    %c0_10 = arith.constant 0 : index
    %12 = vector.load %arg5[%c0_9, %c0_10] : memref<1x128xf32, #tpu.memory_space<vmem>>, vector<1x128xf32>
    %13 = vector.broadcast %12 : vector<1x128xf32> to vector<16x128xf32>
    %14 = arith.addf %11, %13 : vector<16x128xf32>
    %15 = arith.truncf %14 : vector<16x128xf32> to vector<16x128xbf16>
    %c0_11 = arith.constant 0 : index
    %c0_12 = arith.constant 0 : index
    %16 = vector.load %arg6[%c0_11, %c0_12] : memref<128x128xbf16, #tpu.memory_space<vmem>>, vector<128x128xbf16>
    %cst_13 = arith.constant dense<0.000000e+00> : vector<16x128xf32>
    %17 = tpu.matmul %15, %16, %cst_13 {dimension_numbers = #tpu.dot_dimension_numbers<[1], [0], [0], [1], [0, 0, 1, 1], [], []>} : vector<16x128xbf16>, vector<128x128xbf16>, vector<16x128xf32> -> vector<16x128xf32>
    %c0_14 = arith.constant 0 : index
    %c0_15 = arith.constant 0 : index
    %18 = vector.load %arg7[%c0_14, %c0_15] : memref<1x128xf32, #tpu.memory_space<vmem>>, vector<1x128xf32>
    %19 = vector.broadcast %18 : vector<1x128xf32> to vector<16x128xf32>
    %20 = arith.addf %17, %19 : vector<16x128xf32>
    %cst_16 = arith.constant 0.000000e+00 : f32
    %21 = vector.broadcast %cst_16 : f32 to vector<16x128xf32>
    %22 = arith.maximumf %20, %21 : vector<16x128xf32>
    %23 = arith.truncf %22 : vector<16x128xf32> to vector<16x128xbf16>
    %c0_17 = arith.constant 0 : index
    %c0_18 = arith.constant 0 : index
    %24 = vector.load %arg8[%c0_17, %c0_18] : memref<128x128xbf16, #tpu.memory_space<vmem>>, vector<128x128xbf16>
    %cst_19 = arith.constant dense<0.000000e+00> : vector<16x128xf32>
    %25 = tpu.matmul %23, %24, %cst_19 {dimension_numbers = #tpu.dot_dimension_numbers<[1], [0], [0], [1], [0, 0, 1, 1], [], []>} : vector<16x128xbf16>, vector<128x128xbf16>, vector<16x128xf32> -> vector<16x128xf32>
    %c0_20 = arith.constant 0 : index
    %c0_21 = arith.constant 0 : index
    %26 = vector.load %arg9[%c0_20, %c0_21] : memref<1x128xf32, #tpu.memory_space<vmem>>, vector<1x128xf32>
    %27 = vector.broadcast %26 : vector<1x128xf32> to vector<16x128xf32>
    %28 = arith.addf %25, %27 : vector<16x128xf32>
    %29 = arith.truncf %14 : vector<16x128xf32> to vector<16x128xbf16>
    %c0_22 = arith.constant 0 : index
    %c0_23 = arith.constant 0 : index
    %30 = vector.load %arg10[%c0_22, %c0_23] : memref<16x128xbf16, #tpu.memory_space<vmem>>, vector<16x128xbf16>
    tpu.vector_store %arg10[%c0_22, %c0_23], %29 {strides = array<i32>} : memref<16x128xbf16, #tpu.memory_space<vmem>>, vector<16x128xbf16>,
    %31 = arith.truncf %28 : vector<16x128xf32> to vector<16x128xbf16>
    %c0_24 = arith.constant 0 : index
    %c0_25 = arith.constant 0 : index
    %32 = vector.load %arg11[%c0_24, %c0_25] : memref<16x128xbf16, #tpu.memory_space<vmem>>, vector<16x128xbf16>
    tpu.vector_store %arg11[%c0_24, %c0_25], %31 {strides = array<i32>} : memref<16x128xbf16, #tpu.memory_space<vmem>>, vector<16x128xbf16>,
    return
  }
  func.func @transform_0(%arg0: i32) -> (i32, i32) {
    %c0_i32 = arith.constant 0 : i32
    %c0_i32_0 = arith.constant 0 : i32
    return %arg0, %c0_i32 : i32, i32
  }
  func.func @transform_1(%arg0: i32) -> (i32, i32) {
    %c0_i32 = arith.constant 0 : i32
    %c0_i32_0 = arith.constant 0 : i32
    %c0_i32_1 = arith.constant 0 : i32
    return %c0_i32, %c0_i32_0 : i32, i32
  }
  func.func @transform_2(%arg0: i32) -> (i32, i32) {
    %c0_i32 = arith.constant 0 : i32
    %c0_i32_0 = arith.constant 0 : i32
    %c0_i32_1 = arith.constant 0 : i32
    return %c0_i32, %c0_i32_0 : i32, i32
  }
  func.func @transform_3(%arg0: i32) -> (i32, i32) {
    %c0_i32 = arith.constant 0 : i32
    %c0_i32_0 = arith.constant 0 : i32
    %c0_i32_1 = arith.constant 0 : i32
    return %c0_i32, %c0_i32_0 : i32, i32
  }
  func.func @transform_4(%arg0: i32) -> (i32, i32) {
    %c0_i32 = arith.constant 0 : i32
    %c0_i32_0 = arith.constant 0 : i32
    %c0_i32_1 = arith.constant 0 : i32
    return %c0_i32, %c0_i32_0 : i32, i32
  }
  func.func @transform_5(%arg0: i32) -> (i32, i32) {
    %c0_i32 = arith.constant 0 : i32
    %c0_i32_0 = arith.constant 0 : i32
    %c0_i32_1 = arith.constant 0 : i32
    return %c0_i32, %c0_i32_0 : i32, i32
  }
  func.func @transform_6(%arg0: i32) -> (i32, i32) {
    %c0_i32 = arith.constant 0 : i32
    %c0_i32_0 = arith.constant 0 : i32
    %c0_i32_1 = arith.constant 0 : i32
    return %c0_i32, %c0_i32_0 : i32, i32
  }
  func.func @transform_7(%arg0: i32) -> (i32, i32) {
    %c0_i32 = arith.constant 0 : i32
    %c0_i32_0 = arith.constant 0 : i32
    %c0_i32_1 = arith.constant 0 : i32
    return %c0_i32, %c0_i32_0 : i32, i32
  }
  func.func @transform_8(%arg0: i32) -> (i32, i32) {
    %c0_i32 = arith.constant 0 : i32
    %c0_i32_0 = arith.constant 0 : i32
    %c0_i32_1 = arith.constant 0 : i32
    return %c0_i32, %c0_i32_0 : i32, i32
  }
  func.func @transform_9(%arg0: i32) -> (i32, i32) {
    %c0_i32 = arith.constant 0 : i32
    %c0_i32_0 = arith.constant 0 : i32
    return %arg0, %c0_i32 : i32, i32
  }
  func.func @transform_10(%arg0: i32) -> (i32, i32) {
    %c0_i32 = arith.constant 0 : i32
    %c0_i32_0 = arith.constant 0 : i32
    return %arg0, %c0_i32 : i32, i32
  }
}

module attributes {stable_mosaic.version = 11 : i64} {
  func.func @fcae_kernel(%arg0: i32, %arg1: memref<16x128xf32, #tpu.memory_space<vmem>>, %arg2: memref<128x128xbf16, #tpu.memory_space<vmem>>, %arg3: memref<1x128xf32, #tpu.memory_space<vmem>>, %arg4: memref<128x128xbf16, #tpu.memory_space<vmem>>, %arg5: memref<1x128xf32, #tpu.memory_space<vmem>>, %arg6: memref<128x128xbf16, #tpu.memory_space<vmem>>, %arg7: memref<1x128xf32, #tpu.memory_space<vmem>>, %arg8: memref<128x128xbf16, #tpu.memory_space<vmem>>, %arg9: memref<1x128xf32, #tpu.memory_space<vmem>>, %arg10: memref<16x128xbf16, #tpu.memory_space<vmem>>, %arg11: memref<16x128xbf16, #tpu.memory_space<vmem>>) attributes {dimension_semantics = [#tpu.dimension_semantics<parallel>], iteration_bounds = array<i64: 1>, scalar_prefetch = 0 : i64, scratch_operands = 0 : i64, tpu.core_type = #tpu.core_type<tc>, window_params = [{transform_indices = @transform_0, window_bounds = array<i64: 16, 128>}, {pipeline_mode = #tpu.pipeline_mode<synchronous>, transform_indices = @transform_1, window_bounds = array<i64: 128, 128>}, {pipeline_mode = #tpu.pipeline_mode<synchronous>, transform_indices = @transform_2, window_bounds = array<i64: 1, 128>}, {pipeline_mode = #tpu.pipeline_mode<synchronous>, transform_indices = @transform_3, window_bounds = array<i64: 128, 128>}, {pipeline_mode = #tpu.pipeline_mode<synchronous>, transform_indices = @transform_4, window_bounds = array<i64: 1, 128>}, {pipeline_mode = #tpu.pipeline_mode<synchronous>, transform_indices = @transform_5, window_bounds = array<i64: 128, 128>}, {pipeline_mode = #tpu.pipeline_mode<synchronous>, transform_indices = @transform_6, window_bounds = array<i64: 1, 128>}, {pipeline_mode = #tpu.pipeline_mode<synchronous>, transform_indices = @transform_7, window_bounds = array<i64: 128, 128>}, {pipeline_mode = #tpu.pipeline_mode<synchronous>, transform_indices = @transform_8, window_bounds = array<i64: 1, 128>}, {transform_indices = @transform_9, window_bounds = array<i64: 16, 128>}, {transform_indices = @transform_10, window_bounds = array<i64: 16, 128>}]} {
    %c0 = arith.constant 0 : index
    %c0_0 = arith.constant 0 : index
    %0 = vector.load %arg1[%c0, %c0_0] : memref<16x128xf32, #tpu.memory_space<vmem>>, vector<16x128xf32>
    %1 = arith.truncf %0 : vector<16x128xf32> to vector<16x128xbf16>
    %c0_1 = arith.constant 0 : index
    %c0_2 = arith.constant 0 : index
    %2 = vector.load %arg2[%c0_1, %c0_2] : memref<128x128xbf16, #tpu.memory_space<vmem>>, vector<128x128xbf16>
    %cst = arith.constant dense<0.000000e+00> : vector<16x128xf32>
    %3 = tpu.matmul %1, %2, %cst {dimension_numbers = #tpu.dot_dimension_numbers<[1], [0], [0], [1], [0, 0, 1, 1], [], []>} : vector<16x128xbf16>, vector<128x128xbf16>, vector<16x128xf32> -> vector<16x128xf32>
    %c0_3 = arith.constant 0 : index
    %c0_4 = arith.constant 0 : index
    %4 = vector.load %arg3[%c0_3, %c0_4] : memref<1x128xf32, #tpu.memory_space<vmem>>, vector<1x128xf32>
    %5 = vector.broadcast %4 : vector<1x128xf32> to vector<16x128xf32>
    %6 = arith.addf %3, %5 : vector<16x128xf32>
    %cst_5 = arith.constant 0.000000e+00 : f32
    %7 = vector.broadcast %cst_5 : f32 to vector<16x128xf32>
    %8 = arith.maximumf %6, %7 : vector<16x128xf32>
    %9 = arith.truncf %8 : vector<16x128xf32> to vector<16x128xbf16>
    %c0_6 = arith.constant 0 : index
    %c0_7 = arith.constant 0 : index
    %10 = vector.load %arg4[%c0_6, %c0_7] : memref<128x128xbf16, #tpu.memory_space<vmem>>, vector<128x128xbf16>
    %cst_8 = arith.constant dense<0.000000e+00> : vector<16x128xf32>
    %11 = tpu.matmul %9, %10, %cst_8 {dimension_numbers = #tpu.dot_dimension_numbers<[1], [0], [0], [1], [0, 0, 1, 1], [], []>} : vector<16x128xbf16>, vector<128x128xbf16>, vector<16x128xf32> -> vector<16x128xf32>
    %c0_9 = arith.constant 0 : index
    %c0_10 = arith.constant 0 : index
    %12 = vector.load %arg5[%c0_9, %c0_10] : memref<1x128xf32, #tpu.memory_space<vmem>>, vector<1x128xf32>
    %13 = vector.broadcast %12 : vector<1x128xf32> to vector<16x128xf32>
    %14 = arith.addf %11, %13 : vector<16x128xf32>
    %15 = arith.truncf %14 : vector<16x128xf32> to vector<16x128xbf16>
    %c0_11 = arith.constant 0 : index
    %c0_12 = arith.constant 0 : index
    %16 = vector.load %arg6[%c0_11, %c0_12] : memref<128x128xbf16, #tpu.memory_space<vmem>>, vector<128x128xbf16>
    %cst_13 = arith.constant dense<0.000000e+00> : vector<16x128xf32>
    %17 = tpu.matmul %15, %16, %cst_13 {dimension_numbers = #tpu.dot_dimension_numbers<[1], [0], [0], [1], [0, 0, 1, 1], [], []>} : vector<16x128xbf16>, vector<128x128xbf16>, vector<16x128xf32> -> vector<16x128xf32>
    %c0_14 = arith.constant 0 : index
    %c0_15 = arith.constant 0 : index
    %18 = vector.load %arg7[%c0_14, %c0_15] : memref<1x128xf32, #tpu.memory_space<vmem>>, vector<1x128xf32>
    %19 = vector.broadcast %18 : vector<1x128xf32> to vector<16x128xf32>
    %20 = arith.addf %17, %19 : vector<16x128xf32>
    %cst_16 = arith.constant 0.000000e+00 : f32
    %21 = vector.broadcast %cst_16 : f32 to vector<16x128xf32>
    %22 = arith.maximumf %20, %21 : vector<16x128xf32>
    %23 = arith.truncf %22 : vector<16x128xf32> to vector<16x128xbf16>
    %c0_17 = arith.constant 0 : index
    %c0_18 = arith.constant 0 : index
    %24 = vector.load %arg8[%c0_17, %c0_18] : memref<128x128xbf16, #tpu.memory_space<vmem>>, vector<128x128xbf16>
    %cst_19 = arith.constant dense<0.000000e+00> : vector<16x128xf32>
    %25 = tpu.matmul %23, %24, %cst_19 {dimension_numbers = #tpu.dot_dimension_numbers<[1], [0], [0], [1], [0, 0, 1, 1], [], []>} : vector<16x128xbf16>, vector<128x128xbf16>, vector<16x128xf32> -> vector<16x128xf32>
    %c0_20 = arith.constant 0 : index
    %c0_21 = arith.constant 0 : index
    %26 = vector.load %arg9[%c0_20, %c0_21] : memref<1x128xf32, #tpu.memory_space<vmem>>, vector<1x128xf32>
    %27 = vector.broadcast %26 : vector<1x128xf32> to vector<16x128xf32>
    %28 = arith.addf %25, %27 : vector<16x128xf32>
    %29 = arith.truncf %14 : vector<16x128xf32> to vector<16x128xbf16>
    %c0_22 = arith.constant 0 : index
    %c0_23 = arith.constant 0 : index
    %30 = vector.load %arg10[%c0_22, %c0_23] : memref<16x128xbf16, #tpu.memory_space<vmem>>, vector<16x128xbf16>
    tpu.vector_store %arg10[%c0_22, %c0_23], %29 {strides = array<i32>} : memref<16x128xbf16, #tpu.memory_space<vmem>>, vector<16x128xbf16>,
    %31 = arith.truncf %28 : vector<16x128xf32> to vector<16x128xbf16>
    %c0_24 = arith.constant 0 : index
    %c0_25 = arith.constant 0 : index
    %32 = vector.load %arg11[%c0_24, %c0_25] : memref<16x128xbf16, #tpu.memory_space<vmem>>, vector<16x128xbf16>
    tpu.vector_store %arg11[%c0_24, %c0_25], %31 {strides = array<i32>} : memref<16x128xbf16, #tpu.memory_space<vmem>>, vector<16x128xbf16>,
    return
  }
  func.func @transform_0(%arg0: i32) -> (i32, i32) {
    %c0_i32 = arith.constant 0 : i32
    %c0_i32_0 = arith.constant 0 : i32
    return %arg0, %c0_i32 : i32, i32
  }
  func.func @transform_1(%arg0: i32) -> (i32, i32) {
    %c0_i32 = arith.constant 0 : i32
    %c0_i32_0 = arith.constant 0 : i32
    %c0_i32_1 = arith.constant 0 : i32
    return %c0_i32, %c0_i32_0 : i32, i32
  }
  func.func @transform_2(%arg0: i32) -> (i32, i32) {
    %c0_i32 = arith.constant 0 : i32
    %c0_i32_0 = arith.constant 0 : i32
    %c0_i32_1 = arith.constant 0 : i32
    return %c0_i32, %c0_i32_0 : i32, i32
  }
  func.func @transform_3(%arg0: i32) -> (i32, i32) {
    %c0_i32 = arith.constant 0 : i32
    %c0_i32_0 = arith.constant 0 : i32
    %c0_i32_1 = arith.constant 0 : i32
    return %c0_i32, %c0_i32_0 : i32, i32
  }
  func.func @transform_4(%arg0: i32) -> (i32, i32) {
    %c0_i32 = arith.constant 0 : i32
    %c0_i32_0 = arith.constant 0 : i32
    %c0_i32_1 = arith.constant 0 : i32
    return %c0_i32, %c0_i32_0 : i32, i32
  }
  func.func @transform_5(%arg0: i32) -> (i32, i32) {
    %c0_i32 = arith.constant 0 : i32
    %c0_i32_0 = arith.constant 0 : i32
    %c0_i32_1 = arith.constant 0 : i32
    return %c0_i32, %c0_i32_0 : i32, i32
  }
  func.func @transform_6(%arg0: i32) -> (i32, i32) {
    %c0_i32 = arith.constant 0 : i32
    %c0_i32_0 = arith.constant 0 : i32
    %c0_i32_1 = arith.constant 0 : i32
    return %c0_i32, %c0_i32_0 : i32, i32
  }
  func.func @transform_7(%arg0: i32) -> (i32, i32) {
    %c0_i32 = arith.constant 0 : i32
    %c0_i32_0 = arith.constant 0 : i32
    %c0_i32_1 = arith.constant 0 : i32
    return %c0_i32, %c0_i32_0 : i32, i32
  }
  func.func @transform_8(%arg0: i32) -> (i32, i32) {
    %c0_i32 = arith.constant 0 : i32
    %c0_i32_0 = arith.constant 0 : i32
    %c0_i32_1 = arith.constant 0 : i32
    return %c0_i32, %c0_i32_0 : i32, i32
  }
  func.func @transform_9(%arg0: i32) -> (i32, i32) {
    %c0_i32 = arith.constant 0 : i32
    %c0_i32_0 = arith.constant 0 : i32
    return %arg0, %c0_i32 : i32, i32
  }
  func.func @transform_10(%arg0: i32) -> (i32, i32) {
    %c0_i32 = arith.constant 0 : i32
    %c0_i32_0 = arith.constant 0 : i32
    return %arg0, %c0_i32 : i32, i32
  }
}

</mosaic_0001>

<bundles_post_ra>
// kernel: tpu_custom_call.1
= control target key start
LH: loop header
LB: loop body
LE: loop exit
PB: predicated region body
PF: predicated region fallthrough
CT: control target
= control target key end

     0   :  { %16 = vsyncpa [#allocation3], 0  ;;  %s1141_s0 = inlined_call_operand.hbm [shape: f32[16,128], index: 0, kind: input, shape index: {}]   ;;  %s1142_s1 = inlined_call_operand.hbm [shape: bf16[128,128], index: 1, kind: input, shape index: {}]   ;;  %s1143_s2 = inlined_call_operand.vmem [shape: f32[1,128], index: 2, kind: input, shape index: {}]   ;;  %s1144_s3 = inlined_call_operand.hbm [shape: bf16[128,128], index: 3, kind: input, shape index: {}]   ;;  %s1145_s4 = inlined_call_operand.vmem [shape: f32[1,128], index: 4, kind: input, shape index: {}]   ;;  %s1146_s5 = inlined_call_operand.hbm [shape: bf16[128,128], index: 5, kind: input, shape index: {}]   ;;  %s1147_s6 = inlined_call_operand.vmem [shape: f32[1,128], index: 6, kind: input, shape index: {}]   ;;  %s1148_s7 = inlined_call_operand.hbm [shape: bf16[128,128], index: 7, kind: input, shape index: {}]   ;;  %s1149_s8 = inlined_call_operand.vmem [shape: f32[1,128], index: 8, kind: input, shape index: {}]   ;;  %s1150_s9 = inlined_call_operand.hbm [shape: bf16[16,128], index: 9, kind: output, shape index: {0}]   ;;  %s1151_s10 = inlined_call_operand.hbm [shape: bf16[16,128], index: 10, kind: output, shape index: {1}]  }
   0x1   :  { %17 = vsyncpa [#allocation6], 0 }
   0x2   :  { %18 = vsyncpa [#allocation9], 0 }
   0x3   :  { %19 = vsyncpa [#allocation4], 0 }
   0x4   :  { %20 = vsyncpa [#allocation13], 0  ;;  %s982_s13 = smov [#allocation5]  }
   0x5   :  { %s38_s14 = sshll.u32 %s982_s13, 4  ;;  %s39_s14 = int_to_ptr.vmem [resolvable:$true] %s38_s14 }
   0x6   :  { %s840_s15 = scalar_lea.vmem %s39_s14, 1024  ;;  %p845_p1 = scmp.lt.s32.totalorder %s39_s14, %s39_s14 }
   0x7   :  { %p841_p0 = scmp.ne.s32.totalorder %s39_s14, %s840_s15  ;;  %p846_p2 = scmp.lt.s32.totalorder %s840_s15, %s840_s15 }
   0x9   :  { %p847_p3 = por %p846_p2, %p845_p1 }
   0xb   :  { %p848_p4 = pnand %p847_p3, %p841_p0 }
   0xd   :  { %851 = shalt.err (!%p848_p4)
}
   0xe   :  { %s983_s16 = smov 64   ;;  %s984_s17 = smov 4  }
   0xf   :  { %44 = dma.hbm_to_vmem [thread:$0]  %s1142_s1, 1024, %s39_s14, [#allocation6], %s983_s16, %s983_s16, %s984_s17  }
  0x10   :  { %s985_s20 = smov [#allocation8]   ;;  %s986_s22 = smov [#allocation2]  }
  0x11   :  { %s66_s21 = sshll.u32 %s985_s20, 4  ;;  %s26_s23 = sshll.u32 %s986_s22, 4  ;;  %s67_s21 = int_to_ptr.vmem [resolvable:$true] %s66_s21  ;;  %s27_s23 = int_to_ptr.vmem [resolvable:$true] %s26_s23 }
  0x12   :  { %s860_s24 = scalar_lea.vmem %s67_s21, 1024  ;;  %p865_p6 = scmp.lt.s32.totalorder %s67_s21, %s67_s21 }
  0x13   :  { %p861_p5 = scmp.ne.s32.totalorder %s67_s21, %s860_s24  ;;  %p866_p7 = scmp.lt.s32.totalorder %s860_s24, %s860_s24 }
  0x15   :  { %p867_p8 = por %p866_p7, %p865_p6 }
  0x17   :  { %p868_p9 = pnand %p867_p8, %p861_p5 }
  0x19   :  { %871 = shalt.err (!%p868_p9)
}
  0x1a   :  { %72 = dma.hbm_to_vmem [thread:$0]  %s1146_s5, 1024, %s67_s21, [#allocation9], %s983_s16, %s983_s16, %s984_s17  }
  0x1b   :  { %s880_s1 = scalar_lea.vmem %s27_s23, 256  ;;  %p885_p11 = scmp.lt.s32.totalorder %s27_s23, %s27_s23 }
  0x1c   :  { %p881_p10 = scmp.ne.s32.totalorder %s27_s23, %s880_s1  ;;  %p886_p12 = scmp.lt.s32.totalorder %s880_s1, %s880_s1 }
  0x1e   :  { %p887_p13 = por %p886_p12, %p885_p11 }
  0x20   :  { %p888_p0 = pnand %p887_p13, %p881_p10 }
  0x22   :  { %891 = shalt.err (!%p888_p0)
}
  0x23   :  { %s987_s27 = smov 128   ;;  %s988_s28 = smov 8  }
  0x24   :  { %32 = dma.hbm_to_vmem [thread:$0]  %s1141_s0, 256, %s27_s23, [#allocation3], %s987_s27, %s987_s27, %s988_s28  }
  0x25   :  { %s989_s11 = smov [#allocation7]   ;;  %s990_s13 = smov [#allocation10]  }
  0x26   :  { %s52_s12 = sshll.u32 %s989_s11, 4  ;;  %s80_s14 = sshll.u32 %s990_s13, 4  ;;  %s53_s12 = int_to_ptr.vmem [resolvable:$true] %s52_s12  ;;  %s81_s14 = int_to_ptr.vmem [resolvable:$true] %s80_s14 }
  0x27   :  { %s900_s5 = scalar_lea.vmem %s53_s12, 1024  ;;  %p905_p2 = scmp.lt.s32.totalorder %s53_s12, %s53_s12 }
  0x28   :  { %p901_p1 = scmp.ne.s32.totalorder %s53_s12, %s900_s5  ;;  %p906_p3 = scmp.lt.s32.totalorder %s900_s5, %s900_s5 }
  0x2a   :  { %p907_p4 = por %p906_p3, %p905_p2 }
  0x2c   :  { %p908_p5 = pnand %p907_p4, %p901_p1 }
  0x2e   :  { %911 = shalt.err (!%p908_p5)
}
  0x2f   :  { %58 = dma.hbm_to_vmem [thread:$0]  %s1144_s3, 1024, %s53_s12, [#allocation6], %s983_s16, %s983_s16, %s984_s17  }
  0x30   :  { %s920_s0 = scalar_lea.vmem %s81_s14, 1024  ;;  %p925_p7 = scmp.lt.s32.totalorder %s81_s14, %s81_s14 }
  0x31   :  { %p921_p6 = scmp.ne.s32.totalorder %s81_s14, %s920_s0  ;;  %p926_p8 = scmp.lt.s32.totalorder %s920_s0, %s920_s0 }
  0x33   :  { %p927_p9 = por %p926_p8, %p925_p7 }
  0x35   :  { %p928_p10 = pnand %p927_p9, %p921_p6 }
  0x37   :  { %931 = shalt.err (!%p928_p10)
}
  0x38   :  { %86 = dma.hbm_to_vmem [thread:$0]  %s1148_s7, 1024, %s81_s14, [#allocation9], %s983_s16, %s983_s16, %s984_s17  }
  0x39   :  { %972 = dma.done.wait [#allocation3], 256  }
  0x3a   :  { %973 = vsyncadd [#allocation3], 4294967040 }
  0x3b   :  { %974 = dma.done.wait [#allocation6], 2048  }
  0x3c   :  { %975 = vsyncadd [#allocation6], 4294965248 }
  0x3d   :  { %976 = dma.done.wait [#allocation9], 2048  }
  0x3e   :  { %977 = vsyncadd [#allocation9], 4294965248  ;;  %v991_v0 = vmov 0.0   ;;  %vm992_vm0 = vmmov 0   ;;  %v800_v1 = vld [vmem:[#allocation5 + $0x38] sm:$0xff]   ;;  %v801_v2 = vld [vmem:[#allocation5 + $0x30] sm:$0xff]  }
  0x3f   :  { %707 = vmatprep.subr.bf16.mxu0 %v991_v0  ;;  %723 = vmatprep.mubr.msk.bf16.mxu0 %vm992_vm0, %v991_v0  ;;  %v802_v3 = vld [vmem:[#allocation5 + $0x28] sm:$0xff]   ;;  %v808_v4 = vld [vmem:[#allocation7 + $0x38] sm:$0xff]   ;;  %v803_v5 = vld [vmem:[#allocation5 + $0x20] sm:$0xff]   ;;  %s993_s23 = smov [#allocation11]  }
  0x40   :  { %727 = vmatprep.subr.bf16.mxu1 %v991_v0  ;;  %743 = vmatprep.mubr.msk.bf16.mxu1 %vm992_vm0, %v991_v0  ;;  %v809_v6 = vld [vmem:[#allocation7 + $0x30] sm:$0xff]   ;;  %v804_v7 = vld [vmem:[#allocation5 + $0x18] sm:$0xff]   ;;  %v810_v8 = vld [vmem:[#allocation7 + $0x28] sm:$0xff]   ;;  %s587_s24 = sshll.u32 %s993_s23, 4  ;;  %s588_s24 = int_to_ptr.vmem [resolvable:$true] %s587_s24 }
  0x41   :  { %708 = vmatpush3.bf16.msra.mxu0 %v800_v1  ;;  %728 = vmatpush3.bf16.msra.mxu1 %v808_v4  ;;  %v805_v9 = vld [vmem:[#allocation5 + $0x10] sm:$0xff]   ;;  %v811_v10 = vld [vmem:[#allocation7 + $0x20] sm:$0xff]   ;;  %v806_v11 = vld [vmem:[#allocation5 + $0x8] sm:$0xff]   ;;  %s932_s25 = scalar_lea.vmem %s588_s24, 128  ;;  %p937_p12 = scmp.lt.s32.totalorder %s588_s24, %s588_s24 }
  0x42   :  { %709 = vmatprep.subr.bf16.mxu0 %v991_v0  ;;  %729 = vmatprep.subr.bf16.mxu1 %v991_v0  ;;  %v812_v12 = vld [vmem:[#allocation7 + $0x18] sm:$0xff]   ;;  %v807_v13 = vld [vmem:[#allocation5] sm:$0xff]   ;;  %v105_v14 = vld [vmem:[#allocation2] sm:$0xff]  ;;  %p933_p11 = scmp.ne.s32.totalorder %s588_s24, %s932_s25  ;;  %p938_p13 = scmp.lt.s32.totalorder %s932_s25, %s932_s25 }
  0x43   :  { %v106_v15 = vld [vmem:[#allocation2 + $0x8] sm:$0xff]  ;;  %v813_v17 = vld [vmem:[#allocation7 + $0x10] sm:$0xff]   ;;  %v814_v18 = vld [vmem:[#allocation7 + $0x8] sm:$0xff]  }
  0x44   :  { %v107_v16 = vpack.c.bf16 %v106_v15, %v105_v14  ;;  %v815_v19 = vld [vmem:[#allocation7] sm:$0xff]   ;;  %v816_v20 = vld [vmem:[#allocation8 + $0x38] sm:$0xff]   ;;  %v817_v21 = vld [vmem:[#allocation8 + $0x30] sm:$0xff]   ;;  %p939_p0 = por %p938_p13, %p937_p12 }
  0x45   :  { %710 = vmatpush3.bf16.msra.mxu0 %v801_v2  ;;  %730 = vmatpush3.bf16.msra.mxu1 %v809_v6  ;;  %v818_v22 = vld [vmem:[#allocation8 + $0x28] sm:$0xff]   ;;  %v819_v23 = vld [vmem:[#allocation8 + $0x20] sm:$0xff]   ;;  %v820_v24 = vld [vmem:[#allocation8 + $0x18] sm:$0xff]  }
  0x46   :  { %711 = vmatprep.subr.bf16.mxu0 %v991_v0  ;;  %731 = vmatprep.subr.bf16.mxu1 %v991_v0  ;;  %v821_v25 = vld [vmem:[#allocation8 + $0x10] sm:$0xff]   ;;  %v822_v36 = vld [vmem:[#allocation8 + $0x8] sm:$0xff]   ;;  %v823_v37 = vld [vmem:[#allocation8] sm:$0xff]   ;;  %p940_p1 = pnand %p939_p0, %p933_p11 }
  0x47   :  { %v617_v26 = vld [vmem:[%s1143_s2] ss:$0 sm:$0xff]  ;;  %v824_v38 = vld [vmem:[#allocation10 + $0x38] sm:$0xff]   ;;  %v826_v40 = vld [vmem:[#allocation10 + $0x28] sm:$0xff]  }
  0x48   :  { %v825_v39 = vld [vmem:[#allocation10 + $0x30] sm:$0xff]   ;;  %v827_v41 = vld [vmem:[#allocation10 + $0x20] sm:$0xff]   ;;  %v828_v42 = vld [vmem:[#allocation10 + $0x18] sm:$0xff]  }
  0x49   :  { %712 = vmatpush3.bf16.msra.mxu0 %v802_v3  ;;  %732 = vmatpush3.bf16.msra.mxu1 %v810_v8  ;;  %v626_v44 = vld [vmem:[%s1145_s4] ss:$0 sm:$0xff]  ;;  %v830_v52 = vld [vmem:[#allocation10 + $0x8] sm:$0xff]   ;;  %v831_v53 = vld [vmem:[#allocation10] sm:$0xff]  }
  0x4a   :  { %713 = vmatprep.subr.bf16.mxu0 %v991_v0  ;;  %733 = vmatprep.subr.bf16.mxu1 %v991_v0  ;;  %v829_v51 = vld [vmem:[#allocation10 + $0x10] sm:$0xff]  }
  0x4b   :  { %v635_v54 = vld [vmem:[%s1147_s6] ss:$0 sm:$0xff] }
  0x4d   :  { %714 = vmatpush3.bf16.msra.mxu0 %v803_v5  ;;  %734 = vmatpush3.bf16.msra.mxu1 %v811_v10 }
  0x4e   :  { %715 = vmatprep.subr.bf16.mxu0 %v991_v0  ;;  %735 = vmatprep.subr.bf16.mxu1 %v991_v0 }
  0x51   :  { %716 = vmatpush3.bf16.msra.mxu0 %v804_v7  ;;  %736 = vmatpush3.bf16.msra.mxu1 %v812_v12 }
  0x52   :  { %717 = vmatprep.subr.bf16.mxu0 %v991_v0  ;;  %737 = vmatprep.subr.bf16.mxu1 %v991_v0 }
  0x55   :  { %718 = vmatpush3.bf16.msra.mxu0 %v805_v9  ;;  %738 = vmatpush3.bf16.msra.mxu1 %v813_v17 }
  0x56   :  { %719 = vmatprep.subr.bf16.mxu0 %v991_v0  ;;  %739 = vmatprep.subr.bf16.mxu1 %v991_v0 }
  0x59   :  { %720 = vmatpush3.bf16.msra.mxu0 %v806_v11  ;;  %740 = vmatpush3.bf16.msra.mxu1 %v814_v18 }
  0x5a   :  { %721 = vmatprep.subr.bf16.mxu0 %v991_v0  ;;  %741 = vmatprep.subr.bf16.mxu1 %v991_v0 }
  0x5d   :  { %722 = vmatpush3.bf16.msra.mxu0 %v807_v13  ;;  %742 = vmatpush3.bf16.msra.mxu1 %v815_v19 }
  0x5e   :  { %747 = vmatprep.subr.bf16.mxu0 %v991_v0  ;;  %767 = vmatprep.subr.bf16.mxu1 %v991_v0 }
  0x60   :  { %724 = vmatmul.mubr.bf16.vlgmr.msra.gmra.mxu0 %v107_v16 }
  0x61   :  { %763 = vmatprep.mubr.msk.bf16.mxu0 %vm992_vm0, %v991_v0  ;;  %748 = vmatpush3.bf16.msra.mxu0 %v816_v20 }
  0x62   :  { %749 = vmatprep.subr.bf16.mxu0 %v991_v0 }
  0x65   :  { %750 = vmatpush3.bf16.msra.mxu0 %v817_v21 }
  0x66   :  { %751 = vmatprep.subr.bf16.mxu0 %v991_v0 }
  0x69   :  { %752 = vmatpush3.bf16.msra.mxu0 %v818_v22 }
  0x6a   :  { %753 = vmatprep.subr.bf16.mxu0 %v991_v0 }
  0x6d   :  { %754 = vmatpush3.bf16.msra.mxu0 %v819_v23 }
  0x6e   :  { %755 = vmatprep.subr.bf16.mxu0 %v991_v0 }
  0x71   :  { %756 = vmatpush3.bf16.msra.mxu0 %v820_v24 }
  0x72   :  { %757 = vmatprep.subr.bf16.mxu0 %v991_v0 }
  0x75   :  { %758 = vmatpush3.bf16.msra.mxu0 %v821_v25 }
  0x76   :  { %759 = vmatprep.subr.bf16.mxu0 %v991_v0 }
  0x79   :  { %760 = vmatpush3.bf16.msra.mxu0 %v822_v36 }
  0x7a   :  { %761 = vmatprep.subr.bf16.mxu0 %v991_v0 }
  0x7d   :  { %762 = vmatpush3.bf16.msra.mxu0 %v823_v37 }
 0x120   :  { %v213_v27 = vpop.f32.mrf.mxu0 }
 0x121   :  { %v214_v29 = vadd.f32 %v617_v26, %v213_v27 }
 0x122   :  { %v725_v28 = vpop.f32.mrf.mxu0 }
 0x123   :  { %v220_v33 = vmax.f32 %v214_v29, 0.0 }
 0x124   :  { %v216_v30 = vpop.f32.mrf.mxu0 }
 0x125   :  { %v217_v31 = vadd.f32 %v617_v26, %v216_v30 }
 0x126   :  { %v726_v32 = vpop.f32.mrf.mxu0 }
 0x127   :  { %v221_v34 = vmax.f32 %v217_v31, 0.0 }
 0x129   :  { %v222_v35 = vpack.c.bf16 %v221_v34, %v220_v33 }
 0x12b   :  { %744 = vmatmul.mubr.bf16.vlgmr.msra.gmra.mxu1 %v222_v35 }
 0x12c   :  { %783 = vmatprep.mubr.msk.bf16.mxu1 %vm992_vm0, %v991_v0  ;;  %768 = vmatpush3.bf16.msra.mxu1 %v824_v38 }
 0x12d   :  { %769 = vmatprep.subr.bf16.mxu1 %v991_v0 }
 0x130   :  { %770 = vmatpush3.bf16.msra.mxu1 %v825_v39 }
 0x131   :  { %771 = vmatprep.subr.bf16.mxu1 %v991_v0 }
 0x134   :  { %772 = vmatpush3.bf16.msra.mxu1 %v826_v40 }
 0x135   :  { %773 = vmatprep.subr.bf16.mxu1 %v991_v0 }
 0x138   :  { %774 = vmatpush3.bf16.msra.mxu1 %v827_v41 }
 0x139   :  { %775 = vmatprep.subr.bf16.mxu1 %v991_v0 }
 0x13c   :  { %776 = vmatpush3.bf16.msra.mxu1 %v828_v42 }
 0x13d   :  { %777 = vmatprep.subr.bf16.mxu1 %v991_v0 }
 0x140   :  { %778 = vmatpush3.bf16.msra.mxu1 %v829_v51 }
 0x141   :  { %779 = vmatprep.subr.bf16.mxu1 %v991_v0 }
 0x144   :  { %780 = vmatpush3.bf16.msra.mxu1 %v830_v52 }
 0x145   :  { %781 = vmatprep.subr.bf16.mxu1 %v991_v0 }
 0x148   :  { %782 = vmatpush3.bf16.msra.mxu1 %v831_v53 }
 0x1eb   :  { %v328_v43 = vpop.f32.mrf.mxu1 }
 0x1ec   :  { %v329_v47 = vadd.f32 %v626_v44, %v328_v43 }
 0x1ed   :  { %v745_v45 = vpop.f32.mrf.mxu1 }
 0x1ef   :  { %v331_v46 = vpop.f32.mrf.mxu1 }
 0x1f0   :  { %v332_v48 = vadd.f32 %v626_v44, %v331_v46 }
 0x1f1   :  { %v746_v49 = vpop.f32.mrf.mxu1 }
 0x1f2   :  { %v335_v50 = vpack.c.bf16 %v332_v48, %v329_v47 }
 0x1f4   :  { %665 = vst [vmem:[#allocation11] sm:$0xff] %v335_v50   ;;  %764 = vmatmul.mubr.bf16.vlgmr.msra.gmra.mxu0 %v335_v50 }
 0x2b4   :  { %v441_v55 = vpop.f32.mrf.mxu0 }
 0x2b5   :  { %v442_v57 = vadd.f32 %v635_v54, %v441_v55 }
 0x2b6   :  { %v765_v56 = vpop.f32.mrf.mxu0 }
 0x2b7   :  { %v448_v61 = vmax.f32 %v442_v57, 0.0 }
 0x2b8   :  { %v444_v58 = vpop.f32.mrf.mxu0 }
 0x2b9   :  { %v445_v59 = vadd.f32 %v635_v54, %v444_v58 }
 0x2ba   :  { %v766_v60 = vpop.f32.mrf.mxu0 }
 0x2bb   :  { %v449_v62 = vmax.f32 %v445_v59, 0.0 }
 0x2bd   :  { %v450_v63 = vpack.c.bf16 %v449_v62, %v448_v61 }
 0x2bf   :  { %784 = vmatmul.mubr.bf16.vlgmr.msra.gmra.mxu1 %v450_v63 }
 0x2c0   :  { %943 = shalt.err (!%p940_p1)
}
 0x2c1   :  { %593 = dma.vmem_to_hbm [thread:$0]  %s588_s24, 128, %s1150_s9, [#allocation4], %s983_s16, %s983_s16, %s984_s17  }
 0x2c2   :  { %v644_v1 = vld [vmem:[%s1149_s8] ss:$0 sm:$0xff]  ;;  %s994_s28 = smov [#allocation12]  }
 0x2c3   :  { %s599_s29 = sshll.u32 %s994_s28, 4  ;;  %s600_s29 = int_to_ptr.vmem [resolvable:$true] %s599_s29 }
 0x2c4   :  { %s952_s30 = scalar_lea.vmem %s600_s29, 128  ;;  %p957_p3 = scmp.lt.s32.totalorder %s600_s29, %s600_s29 }
 0x2c5   :  { %p953_p2 = scmp.ne.s32.totalorder %s600_s29, %s952_s30  ;;  %p958_p4 = scmp.lt.s32.totalorder %s952_s30, %s952_s30 }
 0x2c7   :  { %p959_p5 = por %p958_p4, %p957_p3 }
 0x2c9   :  { %p960_p6 = pnand %p959_p5, %p953_p2 }
 0x37f   :  { %v556_v0 = vpop.f32.mrf.mxu1 }
 0x380   :  { %v557_v4 = vadd.f32 %v644_v1, %v556_v0 }
 0x381   :  { %v785_v2 = vpop.f32.mrf.mxu1 }
 0x383   :  { %v559_v3 = vpop.f32.mrf.mxu1 }
 0x384   :  { %v560_v5 = vadd.f32 %v644_v1, %v559_v3 }
 0x385   :  { %v786_v6 = vpop.f32.mrf.mxu1 }
 0x386   :  { %v669_v7 = vpack.c.bf16 %v560_v5, %v557_v4 }
 0x388   :  { %670 = vst [vmem:[#allocation12] sm:$0xff] %v669_v7  }
 0x389   :  { %963 = shalt.err (!%p960_p6)
}
 0x38a   :  { %605 = dma.vmem_to_hbm [thread:$0]  %s600_s29, 128, %s1151_s10, [#allocation13], %s983_s16, %s983_s16, %s984_s17  }
 0x38b   :  { %978 = dma.done.wait [#allocation4], 128  }
 0x38c   :  { %979 = vsyncadd [#allocation4], 4294967168 }
 0x38d   :  { %980 = dma.done.wait [#allocation13], 128  }
 0x38e   :  { %981 = vsyncadd [#allocation13], 4294967168 }
 0x38f   :  { %612 = vsyncpa [#allocation3], 1 }
 0x390   :  { %613 = vsyncpa [#allocation6], 1 }
 0x391   :  { %614 = vsyncpa [#allocation9], 1 }
 0x392   :  { %615 = vsyncpa [#allocation4], 1 }
 0x393   :  { %616 = vsyncpa [#allocation13], 1 }

// kernel: tpu_custom_call.1
= control target key start
LH: loop header
LB: loop body
LE: loop exit
PB: predicated region body
PF: predicated region fallthrough
CT: control target
= control target key end

     0   :  { %16 = vsyncpa [#allocation3], 0  ;;  %s1141_s0 = inlined_call_operand.hbm [shape: f32[16,128], index: 0, kind: input, shape index: {}]   ;;  %s1142_s1 = inlined_call_operand.hbm [shape: bf16[128,128], index: 1, kind: input, shape index: {}]   ;;  %s1143_s2 = inlined_call_operand.vmem [shape: f32[1,128], index: 2, kind: input, shape index: {}]   ;;  %s1144_s3 = inlined_call_operand.hbm [shape: bf16[128,128], index: 3, kind: input, shape index: {}]   ;;  %s1145_s4 = inlined_call_operand.vmem [shape: f32[1,128], index: 4, kind: input, shape index: {}]   ;;  %s1146_s5 = inlined_call_operand.hbm [shape: bf16[128,128], index: 5, kind: input, shape index: {}]   ;;  %s1147_s6 = inlined_call_operand.vmem [shape: f32[1,128], index: 6, kind: input, shape index: {}]   ;;  %s1148_s7 = inlined_call_operand.hbm [shape: bf16[128,128], index: 7, kind: input, shape index: {}]   ;;  %s1149_s8 = inlined_call_operand.vmem [shape: f32[1,128], index: 8, kind: input, shape index: {}]   ;;  %s1150_s9 = inlined_call_operand.hbm [shape: bf16[16,128], index: 9, kind: output, shape index: {0}]   ;;  %s1151_s10 = inlined_call_operand.hbm [shape: bf16[16,128], index: 10, kind: output, shape index: {1}]  }
   0x1   :  { %17 = vsyncpa [#allocation6], 0 }
   0x2   :  { %18 = vsyncpa [#allocation9], 0 }
   0x3   :  { %19 = vsyncpa [#allocation4], 0 }
   0x4   :  { %20 = vsyncpa [#allocation13], 0  ;;  %s982_s13 = smov [#allocation5]  }
   0x5   :  { %s38_s14 = sshll.u32 %s982_s13, 4  ;;  %s39_s14 = int_to_ptr.vmem [resolvable:$true] %s38_s14 }
   0x6   :  { %s840_s15 = scalar_lea.vmem %s39_s14, 1024  ;;  %p845_p1 = scmp.lt.s32.totalorder %s39_s14, %s39_s14 }
   0x7   :  { %p841_p0 = scmp.ne.s32.totalorder %s39_s14, %s840_s15  ;;  %p846_p2 = scmp.lt.s32.totalorder %s840_s15, %s840_s15 }
   0x9   :  { %p847_p3 = por %p846_p2, %p845_p1 }
   0xb   :  { %p848_p4 = pnand %p847_p3, %p841_p0 }
   0xd   :  { %851 = shalt.err (!%p848_p4)
}
   0xe   :  { %s983_s16 = smov 64   ;;  %s984_s17 = smov 4  }
   0xf   :  { %44 = dma.hbm_to_vmem [thread:$0]  %s1142_s1, 1024, %s39_s14, [#allocation6], %s983_s16, %s983_s16, %s984_s17  }
  0x10   :  { %s985_s20 = smov [#allocation8]   ;;  %s986_s22 = smov [#allocation2]  }
  0x11   :  { %s66_s21 = sshll.u32 %s985_s20, 4  ;;  %s26_s23 = sshll.u32 %s986_s22, 4  ;;  %s67_s21 = int_to_ptr.vmem [resolvable:$true] %s66_s21  ;;  %s27_s23 = int_to_ptr.vmem [resolvable:$true] %s26_s23 }
  0x12   :  { %s860_s24 = scalar_lea.vmem %s67_s21, 1024  ;;  %p865_p6 = scmp.lt.s32.totalorder %s67_s21, %s67_s21 }
  0x13   :  { %p861_p5 = scmp.ne.s32.totalorder %s67_s21, %s860_s24  ;;  %p866_p7 = scmp.lt.s32.totalorder %s860_s24, %s860_s24 }
  0x15   :  { %p867_p8 = por %p866_p7, %p865_p6 }
  0x17   :  { %p868_p9 = pnand %p867_p8, %p861_p5 }
  0x19   :  { %871 = shalt.err (!%p868_p9)
}
  0x1a   :  { %72 = dma.hbm_to_vmem [thread:$0]  %s1146_s5, 1024, %s67_s21, [#allocation9], %s983_s16, %s983_s16, %s984_s17  }
  0x1b   :  { %s880_s1 = scalar_lea.vmem %s27_s23, 256  ;;  %p885_p11 = scmp.lt.s32.totalorder %s27_s23, %s27_s23 }
  0x1c   :  { %p881_p10 = scmp.ne.s32.totalorder %s27_s23, %s880_s1  ;;  %p886_p12 = scmp.lt.s32.totalorder %s880_s1, %s880_s1 }
  0x1e   :  { %p887_p13 = por %p886_p12, %p885_p11 }
  0x20   :  { %p888_p0 = pnand %p887_p13, %p881_p10 }
  0x22   :  { %891 = shalt.err (!%p888_p0)
}
  0x23   :  { %s987_s27 = smov 128   ;;  %s988_s28 = smov 8  }
  0x24   :  { %32 = dma.hbm_to_vmem [thread:$0]  %s1141_s0, 256, %s27_s23, [#allocation3], %s987_s27, %s987_s27, %s988_s28  }
  0x25   :  { %s989_s11 = smov [#allocation7]   ;;  %s990_s13 = smov [#allocation10]  }
  0x26   :  { %s52_s12 = sshll.u32 %s989_s11, 4  ;;  %s80_s14 = sshll.u32 %s990_s13, 4  ;;  %s53_s12 = int_to_ptr.vmem [resolvable:$true] %s52_s12  ;;  %s81_s14 = int_to_ptr.vmem [resolvable:$true] %s80_s14 }
  0x27   :  { %s900_s5 = scalar_lea.vmem %s53_s12, 1024  ;;  %p905_p2 = scmp.lt.s32.totalorder %s53_s12, %s53_s12 }
  0x28   :  { %p901_p1 = scmp.ne.s32.totalorder %s53_s12, %s900_s5  ;;  %p906_p3 = scmp.lt.s32.totalorder %s900_s5, %s900_s5 }
  0x2a   :  { %p907_p4 = por %p906_p3, %p905_p2 }
  0x2c   :  { %p908_p5 = pnand %p907_p4, %p901_p1 }
  0x2e   :  { %911 = shalt.err (!%p908_p5)
}
  0x2f   :  { %58 = dma.hbm_to_vmem [thread:$0]  %s1144_s3, 1024, %s53_s12, [#allocation6], %s983_s16, %s983_s16, %s984_s17  }
  0x30   :  { %s920_s0 = scalar_lea.vmem %s81_s14, 1024  ;;  %p925_p7 = scmp.lt.s32.totalorder %s81_s14, %s81_s14 }
  0x31   :  { %p921_p6 = scmp.ne.s32.totalorder %s81_s14, %s920_s0  ;;  %p926_p8 = scmp.lt.s32.totalorder %s920_s0, %s920_s0 }
  0x33   :  { %p927_p9 = por %p926_p8, %p925_p7 }
  0x35   :  { %p928_p10 = pnand %p927_p9, %p921_p6 }
  0x37   :  { %931 = shalt.err (!%p928_p10)
}
  0x38   :  { %86 = dma.hbm_to_vmem [thread:$0]  %s1148_s7, 1024, %s81_s14, [#allocation9], %s983_s16, %s983_s16, %s984_s17  }
  0x39   :  { %972 = dma.done.wait [#allocation3], 256  }
  0x3a   :  { %973 = vsyncadd [#allocation3], 4294967040 }
  0x3b   :  { %974 = dma.done.wait [#allocation6], 2048  }
  0x3c   :  { %975 = vsyncadd [#allocation6], 4294965248 }
  0x3d   :  { %976 = dma.done.wait [#allocation9], 2048  }
  0x3e   :  { %977 = vsyncadd [#allocation9], 4294965248  ;;  %v991_v0 = vmov 0.0   ;;  %vm992_vm0 = vmmov 0   ;;  %v800_v1 = vld [vmem:[#allocation5 + $0x38] sm:$0xff]   ;;  %v801_v2 = vld [vmem:[#allocation5 + $0x30] sm:$0xff]  }
  0x3f   :  { %707 = vmatprep.subr.bf16.mxu0 %v991_v0  ;;  %723 = vmatprep.mubr.msk.bf16.mxu0 %vm992_vm0, %v991_v0  ;;  %v802_v3 = vld [vmem:[#allocation5 + $0x28] sm:$0xff]   ;;  %v808_v4 = vld [vmem:[#allocation7 + $0x38] sm:$0xff]   ;;  %v803_v5 = vld [vmem:[#allocation5 + $0x20] sm:$0xff]   ;;  %s993_s23 = smov [#allocation11]  }
  0x40   :  { %727 = vmatprep.subr.bf16.mxu1 %v991_v0  ;;  %743 = vmatprep.mubr.msk.bf16.mxu1 %vm992_vm0, %v991_v0  ;;  %v809_v6 = vld [vmem:[#allocation7 + $0x30] sm:$0xff]   ;;  %v804_v7 = vld [vmem:[#allocation5 + $0x18] sm:$0xff]   ;;  %v810_v8 = vld [vmem:[#allocation7 + $0x28] sm:$0xff]   ;;  %s587_s24 = sshll.u32 %s993_s23, 4  ;;  %s588_s24 = int_to_ptr.vmem [resolvable:$true] %s587_s24 }
  0x41   :  { %708 = vmatpush3.bf16.msra.mxu0 %v800_v1  ;;  %728 = vmatpush3.bf16.msra.mxu1 %v808_v4  ;;  %v805_v9 = vld [vmem:[#allocation5 + $0x10] sm:$0xff]   ;;  %v811_v10 = vld [vmem:[#allocation7 + $0x20] sm:$0xff]   ;;  %v806_v11 = vld [vmem:[#allocation5 + $0x8] sm:$0xff]   ;;  %s932_s25 = scalar_lea.vmem %s588_s24, 128  ;;  %p937_p12 = scmp.lt.s32.totalorder %s588_s24, %s588_s24 }
  0x42   :  { %709 = vmatprep.subr.bf16.mxu0 %v991_v0  ;;  %729 = vmatprep.subr.bf16.mxu1 %v991_v0  ;;  %v812_v12 = vld [vmem:[#allocation7 + $0x18] sm:$0xff]   ;;  %v807_v13 = vld [vmem:[#allocation5] sm:$0xff]   ;;  %v105_v14 = vld [vmem:[#allocation2] sm:$0xff]  ;;  %p933_p11 = scmp.ne.s32.totalorder %s588_s24, %s932_s25  ;;  %p938_p13 = scmp.lt.s32.totalorder %s932_s25, %s932_s25 }
  0x43   :  { %v106_v15 = vld [vmem:[#allocation2 + $0x8] sm:$0xff]  ;;  %v813_v17 = vld [vmem:[#allocation7 + $0x10] sm:$0xff]   ;;  %v814_v18 = vld [vmem:[#allocation7 + $0x8] sm:$0xff]  }
  0x44   :  { %v107_v16 = vpack.c.bf16 %v106_v15, %v105_v14  ;;  %v815_v19 = vld [vmem:[#allocation7] sm:$0xff]   ;;  %v816_v20 = vld [vmem:[#allocation8 + $0x38] sm:$0xff]   ;;  %v817_v21 = vld [vmem:[#allocation8 + $0x30] sm:$0xff]   ;;  %p939_p0 = por %p938_p13, %p937_p12 }
  0x45   :  { %710 = vmatpush3.bf16.msra.mxu0 %v801_v2  ;;  %730 = vmatpush3.bf16.msra.mxu1 %v809_v6  ;;  %v818_v22 = vld [vmem:[#allocation8 + $0x28] sm:$0xff]   ;;  %v819_v23 = vld [vmem:[#allocation8 + $0x20] sm:$0xff]   ;;  %v820_v24 = vld [vmem:[#allocation8 + $0x18] sm:$0xff]  }
  0x46   :  { %711 = vmatprep.subr.bf16.mxu0 %v991_v0  ;;  %731 = vmatprep.subr.bf16.mxu1 %v991_v0  ;;  %v821_v25 = vld [vmem:[#allocation8 + $0x10] sm:$0xff]   ;;  %v822_v36 = vld [vmem:[#allocation8 + $0x8] sm:$0xff]   ;;  %v823_v37 = vld [vmem:[#allocation8] sm:$0xff]   ;;  %p940_p1 = pnand %p939_p0, %p933_p11 }
  0x47   :  { %v617_v26 = vld [vmem:[%s1143_s2] ss:$0 sm:$0xff]  ;;  %v824_v38 = vld [vmem:[#allocation10 + $0x38] sm:$0xff]   ;;  %v826_v40 = vld [vmem:[#allocation10 + $0x28] sm:$0xff]  }
  0x48   :  { %v825_v39 = vld [vmem:[#allocation10 + $0x30] sm:$0xff]   ;;  %v827_v41 = vld [vmem:[#allocation10 + $0x20] sm:$0xff]   ;;  %v828_v42 = vld [vmem:[#allocation10 + $0x18] sm:$0xff]  }
  0x49   :  { %712 = vmatpush3.bf16.msra.mxu0 %v802_v3  ;;  %732 = vmatpush3.bf16.msra.mxu1 %v810_v8  ;;  %v626_v44 = vld [vmem:[%s1145_s4] ss:$0 sm:$0xff]  ;;  %v830_v52 = vld [vmem:[#allocation10 + $0x8] sm:$0xff]   ;;  %v831_v53 = vld [vmem:[#allocation10] sm:$0xff]  }
  0x4a   :  { %713 = vmatprep.subr.bf16.mxu0 %v991_v0  ;;  %733 = vmatprep.subr.bf16.mxu1 %v991_v0  ;;  %v829_v51 = vld [vmem:[#allocation10 + $0x10] sm:$0xff]  }
  0x4b   :  { %v635_v54 = vld [vmem:[%s1147_s6] ss:$0 sm:$0xff] }
  0x4d   :  { %714 = vmatpush3.bf16.msra.mxu0 %v803_v5  ;;  %734 = vmatpush3.bf16.msra.mxu1 %v811_v10 }
  0x4e   :  { %715 = vmatprep.subr.bf16.mxu0 %v991_v0  ;;  %735 = vmatprep.subr.bf16.mxu1 %v991_v0 }
  0x51   :  { %716 = vmatpush3.bf16.msra.mxu0 %v804_v7  ;;  %736 = vmatpush3.bf16.msra.mxu1 %v812_v12 }
  0x52   :  { %717 = vmatprep.subr.bf16.mxu0 %v991_v0  ;;  %737 = vmatprep.subr.bf16.mxu1 %v991_v0 }
  0x55   :  { %718 = vmatpush3.bf16.msra.mxu0 %v805_v9  ;;  %738 = vmatpush3.bf16.msra.mxu1 %v813_v17 }
  0x56   :  { %719 = vmatprep.subr.bf16.mxu0 %v991_v0  ;;  %739 = vmatprep.subr.bf16.mxu1 %v991_v0 }
  0x59   :  { %720 = vmatpush3.bf16.msra.mxu0 %v806_v11  ;;  %740 = vmatpush3.bf16.msra.mxu1 %v814_v18 }
  0x5a   :  { %721 = vmatprep.subr.bf16.mxu0 %v991_v0  ;;  %741 = vmatprep.subr.bf16.mxu1 %v991_v0 }
  0x5d   :  { %722 = vmatpush3.bf16.msra.mxu0 %v807_v13  ;;  %742 = vmatpush3.bf16.msra.mxu1 %v815_v19 }
  0x5e   :  { %747 = vmatprep.subr.bf16.mxu0 %v991_v0  ;;  %767 = vmatprep.subr.bf16.mxu1 %v991_v0 }
  0x60   :  { %724 = vmatmul.mubr.bf16.vlgmr.msra.gmra.mxu0 %v107_v16 }
  0x61   :  { %763 = vmatprep.mubr.msk.bf16.mxu0 %vm992_vm0, %v991_v0  ;;  %748 = vmatpush3.bf16.msra.mxu0 %v816_v20 }
  0x62   :  { %749 = vmatprep.subr.bf16.mxu0 %v991_v0 }
  0x65   :  { %750 = vmatpush3.bf16.msra.mxu0 %v817_v21 }
  0x66   :  { %751 = vmatprep.subr.bf16.mxu0 %v991_v0 }
  0x69   :  { %752 = vmatpush3.bf16.msra.mxu0 %v818_v22 }
  0x6a   :  { %753 = vmatprep.subr.bf16.mxu0 %v991_v0 }
  0x6d   :  { %754 = vmatpush3.bf16.msra.mxu0 %v819_v23 }
  0x6e   :  { %755 = vmatprep.subr.bf16.mxu0 %v991_v0 }
  0x71   :  { %756 = vmatpush3.bf16.msra.mxu0 %v820_v24 }
  0x72   :  { %757 = vmatprep.subr.bf16.mxu0 %v991_v0 }
  0x75   :  { %758 = vmatpush3.bf16.msra.mxu0 %v821_v25 }
  0x76   :  { %759 = vmatprep.subr.bf16.mxu0 %v991_v0 }
  0x79   :  { %760 = vmatpush3.bf16.msra.mxu0 %v822_v36 }
  0x7a   :  { %761 = vmatprep.subr.bf16.mxu0 %v991_v0 }
  0x7d   :  { %762 = vmatpush3.bf16.msra.mxu0 %v823_v37 }
 0x120   :  { %v213_v27 = vpop.f32.mrf.mxu0 }
 0x121   :  { %v214_v29 = vadd.f32 %v617_v26, %v213_v27 }
 0x122   :  { %v725_v28 = vpop.f32.mrf.mxu0 }
 0x123   :  { %v220_v33 = vmax.f32 %v214_v29, 0.0 }
 0x124   :  { %v216_v30 = vpop.f32.mrf.mxu0 }
 0x125   :  { %v217_v31 = vadd.f32 %v617_v26, %v216_v30 }
 0x126   :  { %v726_v32 = vpop.f32.mrf.mxu0 }
 0x127   :  { %v221_v34 = vmax.f32 %v217_v31, 0.0 }
 0x129   :  { %v222_v35 = vpack.c.bf16 %v221_v34, %v220_v33 }
 0x12b   :  { %744 = vmatmul.mubr.bf16.vlgmr.msra.gmra.mxu1 %v222_v35 }
 0x12c   :  { %783 = vmatprep.mubr.msk.bf16.mxu1 %vm992_vm0, %v991_v0  ;;  %768 = vmatpush3.bf16.msra.mxu1 %v824_v38 }
 0x12d   :  { %769 = vmatprep.subr.bf16.mxu1 %v991_v0 }
 0x130   :  { %770 = vmatpush3.bf16.msra.mxu1 %v825_v39 }
 0x131   :  { %771 = vmatprep.subr.bf16.mxu1 %v991_v0 }
 0x134   :  { %772 = vmatpush3.bf16.msra.mxu1 %v826_v40 }
 0x135   :  { %773 = vmatprep.subr.bf16.mxu1 %v991_v0 }
 0x138   :  { %774 = vmatpush3.bf16.msra.mxu1 %v827_v41 }
 0x139   :  { %775 = vmatprep.subr.bf16.mxu1 %v991_v0 }
 0x13c   :  { %776 = vmatpush3.bf16.msra.mxu1 %v828_v42 }
 0x13d   :  { %777 = vmatprep.subr.bf16.mxu1 %v991_v0 }
 0x140   :  { %778 = vmatpush3.bf16.msra.mxu1 %v829_v51 }
 0x141   :  { %779 = vmatprep.subr.bf16.mxu1 %v991_v0 }
 0x144   :  { %780 = vmatpush3.bf16.msra.mxu1 %v830_v52 }
 0x145   :  { %781 = vmatprep.subr.bf16.mxu1 %v991_v0 }
 0x148   :  { %782 = vmatpush3.bf16.msra.mxu1 %v831_v53 }
 0x1eb   :  { %v328_v43 = vpop.f32.mrf.mxu1 }
 0x1ec   :  { %v329_v47 = vadd.f32 %v626_v44, %v328_v43 }
 0x1ed   :  { %v745_v45 = vpop.f32.mrf.mxu1 }
 0x1ef   :  { %v331_v46 = vpop.f32.mrf.mxu1 }
 0x1f0   :  { %v332_v48 = vadd.f32 %v626_v44, %v331_v46 }
 0x1f1   :  { %v746_v49 = vpop.f32.mrf.mxu1 }
 0x1f2   :  { %v335_v50 = vpack.c.bf16 %v332_v48, %v329_v47 }
 0x1f4   :  { %665 = vst [vmem:[#allocation11] sm:$0xff] %v335_v50   ;;  %764 = vmatmul.mubr.bf16.vlgmr.msra.gmra.mxu0 %v335_v50 }
 0x2b4   :  { %v441_v55 = vpop.f32.mrf.mxu0 }
 0x2b5   :  { %v442_v57 = vadd.f32 %v635_v54, %v441_v55 }
 0x2b6   :  { %v765_v56 = vpop.f32.mrf.mxu0 }
 0x2b7   :  { %v448_v61 = vmax.f32 %v442_v57, 0.0 }
 0x2b8   :  { %v444_v58 = vpop.f32.mrf.mxu0 }
 0x2b9   :  { %v445_v59 = vadd.f32 %v635_v54, %v444_v58 }
 0x2ba   :  { %v766_v60 = vpop.f32.mrf.mxu0 }
 0x2bb   :  { %v449_v62 = vmax.f32 %v445_v59, 0.0 }
 0x2bd   :  { %v450_v63 = vpack.c.bf16 %v449_v62, %v448_v61 }
 0x2bf   :  { %784 = vmatmul.mubr.bf16.vlgmr.msra.gmra.mxu1 %v450_v63 }
 0x2c0   :  { %943 = shalt.err (!%p940_p1)
}
 0x2c1   :  { %593 = dma.vmem_to_hbm [thread:$0]  %s588_s24, 128, %s1150_s9, [#allocation4], %s983_s16, %s983_s16, %s984_s17  }
 0x2c2   :  { %v644_v1 = vld [vmem:[%s1149_s8] ss:$0 sm:$0xff]  ;;  %s994_s28 = smov [#allocation12]  }
 0x2c3   :  { %s599_s29 = sshll.u32 %s994_s28, 4  ;;  %s600_s29 = int_to_ptr.vmem [resolvable:$true] %s599_s29 }
 0x2c4   :  { %s952_s30 = scalar_lea.vmem %s600_s29, 128  ;;  %p957_p3 = scmp.lt.s32.totalorder %s600_s29, %s600_s29 }
 0x2c5   :  { %p953_p2 = scmp.ne.s32.totalorder %s600_s29, %s952_s30  ;;  %p958_p4 = scmp.lt.s32.totalorder %s952_s30, %s952_s30 }
 0x2c7   :  { %p959_p5 = por %p958_p4, %p957_p3 }
 0x2c9   :  { %p960_p6 = pnand %p959_p5, %p953_p2 }
 0x37f   :  { %v556_v0 = vpop.f32.mrf.mxu1 }
 0x380   :  { %v557_v4 = vadd.f32 %v644_v1, %v556_v0 }
 0x381   :  { %v785_v2 = vpop.f32.mrf.mxu1 }
 0x383   :  { %v559_v3 = vpop.f32.mrf.mxu1 }
 0x384   :  { %v560_v5 = vadd.f32 %v644_v1, %v559_v3 }
 0x385   :  { %v786_v6 = vpop.f32.mrf.mxu1 }
 0x386   :  { %v669_v7 = vpack.c.bf16 %v560_v5, %v557_v4 }
 0x388   :  { %670 = vst [vmem:[#allocation12] sm:$0xff] %v669_v7  }
 0x389   :  { %963 = shalt.err (!%p960_p6)
}
 0x38a   :  { %605 = dma.vmem_to_hbm [thread:$0]  %s600_s29, 128, %s1151_s10, [#allocation13], %s983_s16, %s983_s16, %s984_s17  }
 0x38b   :  { %978 = dma.done.wait [#allocation4], 128  }
 0x38c   :  { %979 = vsyncadd [#allocation4], 4294967168 }
 0x38d   :  { %980 = dma.done.wait [#allocation13], 128  }
 0x38e   :  { %981 = vsyncadd [#allocation13], 4294967168 }
 0x38f   :  { %612 = vsyncpa [#allocation3], 1 }
 0x390   :  { %613 = vsyncpa [#allocation6], 1 }
 0x391   :  { %614 = vsyncpa [#allocation9], 1 }
 0x392   :  { %615 = vsyncpa [#allocation4], 1 }
 0x393   :  { %616 = vsyncpa [#allocation13], 1 }

</bundles_post_ra>
